<compile_context>
chip_gen: v7x
topology: tpu7x:2x2x1
jax: 0.10.0
libtpu: 0.0.40
codegen_flags: <defaults>
</compile_context>

<pallas_src>
import math
import functools

import jax
import jax.numpy as jnp
from jax.experimental import pallas as pl
from jax.experimental.pallas import tpu as pltpu


# ---------------------------------------------------------------------------
# Kernels
# ---------------------------------------------------------------------------
def _pe_add_kernel(x_ref, pe_ref, o_ref):
    # (TR, L) + (1, L) broadcast add on the VPU; cast back to the output dtype
    # (pe is f32, so a bf16 input would otherwise promote).
    o_ref[...] = (x_ref[...] + pe_ref[...]).astype(o_ref.dtype)


def _pe_add_dropout_kernel(x_ref, pe_ref, u_ref, o_ref, *, rate):
    # Inverted dropout, fused with the broadcast add.
    # TODO(synk): on real TPU hardware, pltpu.prng_seed(seed + pl.program_id(0))
    # + pltpu.prng_random_bits would avoid streaming the uniform array from HBM,
    # but those primitives do not lower in the CPU interpret sandbox.
    y = x_ref[...] + pe_ref[...]
    keep = u_ref[...] >= rate
    o_ref[...] = jnp.where(keep, y * (1.0 / (1.0 - rate)), 0.0).astype(o_ref.dtype)


def _choose_row_tile(rows):
    # Largest power-of-two tile (multiple of 8 sublanes) that divides `rows`;
    # otherwise use the full extent as a single block (legal: equals full dim).
    for tr in (1024, 512, 256, 128, 64, 32, 16, 8):
        if rows % tr == 0:
            return tr
    return rows


# ---------------------------------------------------------------------------
# Module equivalent
# ---------------------------------------------------------------------------
class PositionalEncoding:
    """JAX/Pallas port of the PyTorch PositionalEncoding module."""

    def __init__(self, embed_size, dropout, maxlen=5000):
        self.embed_size = int(embed_size)
        self.dropout_rate = float(dropout)
        self.maxlen = int(maxlen)
        den = jnp.exp(
            -jnp.arange(0, embed_size, 2, dtype=jnp.float32)
            * math.log(10000.0)
            / embed_size
        )
        pos = jnp.arange(0, maxlen, dtype=jnp.float32).reshape(maxlen, 1)
        pe = jnp.zeros((maxlen, embed_size), jnp.float32)
        pe = pe.at[:, 0::2].set(jnp.sin(pos * den))
        pe = pe.at[:, 1::2].set(jnp.cos(pos * den))
        self.pos_embedding = pe[None]  # (1, maxlen, embed_size)

    # -- layout selection ---------------------------------------------------
    def _layout(self, B, S, E):
        """Pick a lane-dense (rows, lanes) layout and the matching PE vector."""
        pe_row = self.pos_embedding[0, S, :]  # (E,) -- replicates the PyTorch quirk
        total = B * S * E
        if E % 128 == 0:
            # E already lane-dense: keep (B*S, E).
            return B * S, E, pe_row
        if total % 128 == 0 and 128 % E == 0:
            # Row-major flatten to width 128. Since 128 % E == 0, lane l of every
            # row corresponds to embedding index l % E, so the PE row tiles cleanly.
            return total // 128, 128, jnp.tile(pe_row, 128 // E)
        # Correct-but-lane-sparse fallback for awkward E.
        return B * S, E, pe_row

    # -- forward ------------------------------------------------------------
    def __call__(self, token_embedding, *, training=False, rng=None):
        B, S, E = token_embedding.shape
        assert E == self.embed_size
        assert S < self.maxlen, "seq_len must be < maxlen (PyTorch would IndexError)"

        rows, lanes, pe_vec = self._layout(B, S, E)
        x2d = token_embedding.reshape(rows, lanes)
        pe2d = pe_vec.reshape(1, lanes).astype(jnp.float32)

        tr = _choose_row_tile(rows)
        grid = (rows // tr,)
        x_spec = pl.BlockSpec((tr, lanes), lambda i: (i, 0))
        pe_spec = pl.BlockSpec((1, lanes), lambda i: (0, 0))  # resident in VMEM
        out_shape = jax.ShapeDtypeStruct((rows, lanes), token_embedding.dtype)
        cparams = pltpu.CompilerParams(dimension_semantics=("parallel",))

        if (not training) or self.dropout_rate == 0.0:
            out2d = pl.pallas_call(
                _pe_add_kernel,
                out_shape=out_shape,
                grid=grid,
                in_specs=[x_spec, pe_spec],
                out_specs=x_spec,
                compiler_params=cparams,
            )(x2d, pe2d)
        else:
            if rng is None:
                rng = jax.random.PRNGKey(0)
            u = jax.random.uniform(rng, (rows, lanes), dtype=jnp.float32)
            out2d = pl.pallas_call(
                functools.partial(_pe_add_dropout_kernel, rate=self.dropout_rate),
                out_shape=out_shape,
                grid=grid,
                in_specs=[x_spec, pe_spec, x_spec],  # u shares x's block layout
                out_specs=x_spec,
                compiler_params=cparams,
            )(x2d, pe2d, u)

        return out2d.reshape(B, S, E)


# ---------------------------------------------------------------------------
# Main
# ---------------------------------------------------------------------------
if __name__ == "__main__":
    B, S, E = 2, 8, 32
    dropout_rate = 0.1
    maxlen = 128  # original default is 5000; works too, just bigger

    key = jax.random.PRNGKey(0)
    x = jax.random.normal(key, (B, S, E), dtype=jnp.float32)

    mod = PositionalEncoding(E, dropout_rate, maxlen=maxlen)

    # --- eval mode (dropout == identity): must match the reference exactly ---
    out_eval = jax.block_until_ready(mod(x, training=False))
    ref = x + mod.pos_embedding[:, S, :].reshape(1, 1, E)
    assert out_eval.shape == (B, S, E)
    assert jnp.allclose(out_eval, ref, atol=1e-6), "eval-mode mismatch"

    # --- training mode (fused inverted dropout) ------------------------------
    out_train = jax.block_until_ready(
        mod(x, training=True, rng=jax.random.PRNGKey(42))
    )
    y = ref / (1.0 - dropout_rate)
    ok = jnp.all((out_train == 0.0) | (jnp.abs(out_train - y) < 1e-5))
    assert bool(ok), "training-mode dropout mismatch"

    print("KERNEL_OK")
</pallas_src>

<mosaic_0001>
module attributes {stable_mosaic.version = 11 : i64} {
  func.func @_pe_add_kernel(%arg0: i32, %arg1: memref<4x128xf32, #tpu.memory_space<vmem>>, %arg2: memref<1x128xf32, #tpu.memory_space<vmem>>, %arg3: memref<4x128xf32, #tpu.memory_space<vmem>>) attributes {dimension_semantics = [#tpu.dimension_semantics<parallel>], iteration_bounds = array<i64: 1>, scalar_prefetch = 0 : i64, scratch_operands = 0 : i64, tpu.core_type = #tpu.core_type<tc>, window_params = [{transform_indices = @transform_0, window_bounds = array<i64: 4, 128>}, {pipeline_mode = #tpu.pipeline_mode<synchronous>, transform_indices = @transform_1, window_bounds = array<i64: 1, 128>}, {transform_indices = @transform_2, window_bounds = array<i64: 4, 128>}]} {
    %c0 = arith.constant 0 : index
    %c0_0 = arith.constant 0 : index
    %0 = vector.load %arg1[%c0, %c0_0] : memref<4x128xf32, #tpu.memory_space<vmem>>, vector<4x128xf32>
    %c0_1 = arith.constant 0 : index
    %c0_2 = arith.constant 0 : index
    %1 = vector.load %arg2[%c0_1, %c0_2] : memref<1x128xf32, #tpu.memory_space<vmem>>, vector<1x128xf32>
    %2 = vector.broadcast %1 : vector<1x128xf32> to vector<4x128xf32>
    %3 = arith.addf %0, %2 : vector<4x128xf32>
    %c0_3 = arith.constant 0 : index
    %c0_4 = arith.constant 0 : index
    %4 = vector.load %arg3[%c0_3, %c0_4] : memref<4x128xf32, #tpu.memory_space<vmem>>, vector<4x128xf32>
    tpu.vector_store %arg3[%c0_3, %c0_4], %3 {strides = array<i32>} : memref<4x128xf32, #tpu.memory_space<vmem>>, vector<4x128xf32>,
    return
  }
  func.func @transform_0(%arg0: i32) -> (i32, i32) {
    %c0_i32 = arith.constant 0 : i32
    %c0_i32_0 = arith.constant 0 : i32
    return %arg0, %c0_i32 : i32, i32
  }
  func.func @transform_1(%arg0: i32) -> (i32, i32) {
    %c0_i32 = arith.constant 0 : i32
    %c0_i32_0 = arith.constant 0 : i32
    %c0_i32_1 = arith.constant 0 : i32
    return %c0_i32, %c0_i32_0 : i32, i32
  }
  func.func @transform_2(%arg0: i32) -> (i32, i32) {
    %c0_i32 = arith.constant 0 : i32
    %c0_i32_0 = arith.constant 0 : i32
    return %arg0, %c0_i32 : i32, i32
  }
}

</mosaic_0001>

<bundles_post_ra>
// kernel: tpu_custom_call.1
= control target key start
LH: loop header
LB: loop body
LE: loop exit
PB: predicated region body
PF: predicated region fallthrough
CT: control target
= control target key end

     0   :  { %7 = vsyncpa [#allocation3], 0  ;;  %s144_s0 = inlined_call_operand.hbm [shape: f32[4,128], index: 0, kind: input, shape index: {}]   ;;  %s145_s1 = inlined_call_operand.vmem [shape: f32[1,128], index: 1, kind: input, shape index: {}]   ;;  %s146_s2 = inlined_call_operand.hbm [shape: f32[4,128], index: 2, kind: output, shape index: {}]  }
   0x1   :  { %8 = vsyncpa [#allocation4], 0  ;;  %s100_s9 = smov [#allocation2]   ;;  %s52_s13 = scalar_lea.hbm %s144_s0, 64 }
   0x2   :  { %s15_s10 = sshll.u32 %s100_s9, 4  ;;  %p53_p0 = scmp.ne.s32.totalorder %s144_s0, %s52_s13  ;;  %s16_s10 = int_to_ptr.vmem [resolvable:$true] %s15_s10 }
   0x3   :  { %p56_p1 = scmp.lt.u32.totalorder %s52_s13, %s144_s0 }
   0x5   :  { %p58_p2 = pnand %p56_p1, %p53_p0 }
   0x7   :  { %61 = shalt.err (!%p58_p2)
}
   0x8   :  { %s62_s18 = scalar_lea.vmem %s16_s10, 64  ;;  %p67_p4 = scmp.lt.s32.totalorder %s16_s10, %s16_s10 }
   0x9   :  { %p63_p3 = scmp.ne.s32.totalorder %s16_s10, %s62_s18  ;;  %p68_p5 = scmp.lt.s32.totalorder %s62_s18, %s62_s18 }
   0xb   :  { %p69_p6 = por %p68_p5, %p67_p4 }
   0xd   :  { %p70_p7 = pnand %p69_p6, %p63_p3 }
   0xf   :  { %73 = shalt.err (!%p70_p7)
}
  0x10   :  { %18 = dma.hbm_to_vmem [thread:$0]  %s144_s0, 64, %s16_s10, [#allocation3]  }
  0x11   :  { %96 = dma.done.wait [#allocation3], 64  }
  0x12   :  { %97 = vsyncadd [#allocation3], 4294967232  ;;  %s101_s21 = smov [#allocation5]   ;;  %v24_v0 = vld [vmem:[#allocation2] sm:$0xf] }
  0x13   :  { %s40_s22 = sshll.u32 %s101_s21, 4  ;;  %v49_v1 = vld [vmem:[%s145_s1] ss:$0 sm:$0xff]  ;;  %s41_s22 = int_to_ptr.vmem [resolvable:$true] %s40_s22 }
  0x14   :  { %v32_v2 = vadd.f32 %v49_v1, %v24_v0  ;;  %s74_s25 = scalar_lea.vmem %s41_s22, 64  ;;  %p79_p9 = scmp.lt.s32.totalorder %s41_s22, %s41_s22 }
  0x15   :  { %p75_p8 = scmp.ne.s32.totalorder %s41_s22, %s74_s25  ;;  %p80_p10 = scmp.lt.s32.totalorder %s74_s25, %s74_s25 }
  0x16   :  { %33 = vst [vmem:[#allocation5] sm:$0xf] %v32_v2 }
  0x17   :  { %p81_p11 = por %p80_p10, %p79_p9 }
  0x19   :  { %p82_p12 = pnand %p81_p11, %p75_p8 }
  0x1b   :  { %85 = shalt.err (!%p82_p12)
}
  0x1c   :  { %s86_s27 = scalar_lea.hbm %s146_s2, 64 }
  0x1d   :  { %p87_p13 = scmp.ne.s32.totalorder %s146_s2, %s86_s27  ;;  %p90_p0 = scmp.lt.u32.totalorder %s86_s27, %s146_s2 }
  0x1f   :  { %p92_p1 = pnand %p90_p0, %p87_p13 }
  0x21   :  { %95 = shalt.err (!%p92_p1)
}
  0x22   :  { %43 = dma.vmem_to_hbm [thread:$0]  %s41_s22, 64, %s146_s2, [#allocation4]  }
  0x23   :  { %98 = dma.done.wait [#allocation4], 64  }
  0x24   :  { %99 = vsyncadd [#allocation4], 4294967232 }
  0x25   :  { %47 = vsyncpa [#allocation3], 1 }
  0x26   :  { %48 = vsyncpa [#allocation4], 1 }

</bundles_post_ra>
